<compile_context>
chip_gen: v7x
topology: tpu7x:2x2x1
jax: 0.10.0
libtpu: 0.0.40
codegen_flags: <defaults>
</compile_context>

<pallas_src>
import functools
import math

import jax
import jax.numpy as jnp
from jax.experimental import pallas as pl
from jax.experimental.pallas import tpu as pltpu

NUM_CLASSES = 4
GAMMA = 2
_P_MIN = 1e-4        # matches y_pred.clamp(min=0.0001, max=1.0)
_TS_MAX = 1024       # sublane rows per tile -> up to 131072 pixels / grid step


def _round_up(x, m):
    return (x + m - 1) // m * m


def _pow_gamma(base, gamma):
    """base**gamma specialised for small integer gamma (avoids EUP pow)."""
    g = float(gamma)
    if g == int(g) and 0 <= int(g) <= 8:
        gi = int(g)
        if gi == 0:
            return jnp.ones_like(base)
        out = base
        for _ in range(gi - 1):
            out = out * base
        return out
    # Non-integer gamma: guard base == 0 (p_t == 1 is reachable after clamp).
    safe = jnp.maximum(base, 1e-30)
    return jnp.where(base > 0, jnp.exp(g * jnp.log(safe)), 0.0)


def _focal_kernel(alpha_ref, logits_ref, labels_ref, out_ref, acc_ref, *,
                  num_classes, gamma, rows, tile_rows, need_row_mask, scale):
    # alpha_ref : (C,)                    f32  SMEM
    # logits_ref: (1, C, tile_rows, 128)  float (any dtype, widened here)
    # labels_ref: (1, tile_rows, 128)     i32   (-1 in lane-padded pixels)
    # out_ref   : (1, 1)                  f32   (written on the last step)
    # acc_ref   : (tile_rows, 128)        f32   VMEM per-pixel-slot partials
    b = pl.program_id(0)
    t = pl.program_id(1)

    @pl.when(jnp.logical_and(b == 0, t == 0))
    def _init():
        acc_ref[...] = jnp.zeros_like(acc_ref)

    labels = labels_ref[0]                                    # (TR, 128) i32

    # ---- unrolled class loop: everything is full (sublane x lane) VPU ----
    cls = [logits_ref[0, ci].astype(jnp.float32) for ci in range(num_classes)]
    m = cls[0]
    for ci in range(1, num_classes):
        m = jnp.maximum(m, cls[ci])

    sumexp = jnp.zeros_like(m)
    logit_t = jnp.zeros_like(m)
    alpha_t = jnp.zeros_like(m)
    for ci in range(num_classes):
        sumexp = sumexp + jnp.exp(cls[ci] - m)
        sel = labels == ci
        logit_t = jnp.where(sel, cls[ci], logit_t)
        alpha_t = jnp.where(sel, alpha_ref[ci], alpha_t)      # scalar bcast

    # Log-domain softmax select; clamping log p_t == clamping p_t to [1e-4, 1].
    log_p_t = logit_t - m - jnp.log(sumexp)
    log_p_t = jnp.clip(log_p_t, math.log(_P_MIN), 0.0)
    p_t = jnp.exp(log_p_t)

    focal = -alpha_t * _pow_gamma(1.0 - p_t, gamma) * log_p_t  # (TR, 128)

    if need_row_mask:
        # Mask sublane-rows past the true pixel count (ragged last tile reads
        # undefined data from the edge block).
        row_idx = t * tile_rows + jax.lax.broadcasted_iota(
            jnp.int32, focal.shape, 0)
        focal = jnp.where(row_idx < rows, focal, 0.0)

    acc_ref[...] += focal      # pure elementwise add; no per-step reduction

    @pl.when(jnp.logical_and(b == pl.num_programs(0) - 1,
                             t == pl.num_programs(1) - 1))
    def _finalize():
        out_ref[...] = (jnp.sum(acc_ref[...]) * scale).reshape(1, 1)


def focal_loss(y_pred, y_true, alpha=None, gamma=GAMMA, reduction='mean'):
    """Focal loss. y_pred: (N,C,H,W) float logits, y_true: (N,H,W) int."""
    n, c, h, w = y_pred.shape
    hw = h * w
    total = n * hw

    if alpha is None:
        alpha = jnp.ones((c,), dtype=jnp.float32)
    alpha = jnp.asarray(alpha, dtype=jnp.float32).reshape(c)

    # Native NCHW layout: pixels are already the fast axis -> free reshapes.
    logits = y_pred.reshape(n, c, hw)
    labels = y_true.reshape(n, hw).astype(jnp.int32)

    hw_pad = _round_up(hw, 128)
    if hw_pad != hw:
        # Rare path: lane-pad so pixels tile as (rows, 128). Padded labels are
        # -1, which matches no class -> alpha_t = 0 -> contributes exactly 0.
        logits = jnp.pad(logits, ((0, 0), (0, 0), (0, hw_pad - hw)))
        labels = jnp.pad(labels, ((0, 0), (0, hw_pad - hw)),
                         constant_values=-1)
    rows = hw_pad // 128
    logits = logits.reshape(n, c, rows, 128)
    labels = labels.reshape(n, rows, 128)

    tile_rows = rows if rows <= _TS_MAX else _TS_MAX
    n_tiles = -(-rows // tile_rows)
    need_row_mask = (n_tiles * tile_rows != rows)

    if reduction == 'mean':
        scale = 1.0 / float(total)
    elif reduction == 'sum':
        scale = 1.0
    else:
        # TODO(synk): reduction='none' (per-pixel map output) not implemented.
        raise NotImplementedError("only 'mean' and 'sum' reductions supported")

    kernel = functools.partial(
        _focal_kernel, num_classes=c, gamma=gamma, rows=rows,
        tile_rows=tile_rows, need_row_mask=need_row_mask, scale=scale)

    out = pl.pallas_call(
        kernel,
        out_shape=jax.ShapeDtypeStruct((1, 1), jnp.float32),
        grid_spec=pltpu.PrefetchScalarGridSpec(
            num_scalar_prefetch=0,
            grid=(n, n_tiles),
            in_specs=[
                pl.BlockSpec(memory_space=pltpu.MemorySpace.SMEM),    # alpha
                pl.BlockSpec((1, c, tile_rows, 128),
                             lambda b, t: (b, 0, t, 0)),              # logits
                pl.BlockSpec((1, tile_rows, 128),
                             lambda b, t: (b, t, 0)),                 # labels
            ],
            out_specs=pl.BlockSpec((1, 1), lambda b, t: (0, 0)),
            scratch_shapes=[pltpu.VMEM((tile_rows, 128), jnp.float32)],
        ),
        compiler_params=pltpu.CompilerParams(
            # TODO(synk): on v7x (2 TCs) split the pixel axis into per-core
            # partial sums instead of one serial accumulator.
            dimension_semantics=("arbitrary", "arbitrary")),
    )(alpha, logits, labels)

    return out[0, 0]


def _reference_focal_loss(y_pred, y_true, alpha=None, gamma=GAMMA):
    n, c, h, w = y_pred.shape
    if alpha is None:
        alpha = jnp.ones((c,), dtype=jnp.float32)
    alpha = jnp.asarray(alpha, dtype=jnp.float32)
    alpha_t = alpha[y_true]                                    # (N,H,W)
    p = jax.nn.softmax(y_pred.astype(jnp.float32), axis=1)
    onehot = jax.nn.one_hot(y_true, c, dtype=jnp.float32)      # (N,H,W,C)
    onehot = jnp.transpose(onehot, (0, 3, 1, 2))               # (N,C,H,W)
    p_t = jnp.sum(p * onehot, axis=1)
    p_t = jnp.clip(p_t, _P_MIN, 1.0)
    loss = -alpha_t * (1.0 - p_t) ** gamma * jnp.log(p_t)
    return jnp.mean(loss)


if __name__ == "__main__":
    key = jax.random.PRNGKey(0)
    k1, k2, k3, k4 = jax.random.split(key, 4)

    # Test 1: default alpha, pixel count divisible by 128.
    N, C, H, W = 2, NUM_CLASSES, 16, 16
    y_pred = jax.random.normal(k1, (N, C, H, W), dtype=jnp.float32)
    y_true = jax.random.randint(k2, (N, H, W), 0, C, dtype=jnp.int32)
    out = jax.block_until_ready(focal_loss(y_pred, y_true))
    ref = _reference_focal_loss(y_pred, y_true)
    assert jnp.allclose(out, ref, rtol=1e-5, atol=1e-5), (out, ref)

    # Test 2: custom alpha, pixel count NOT divisible by 128 (pad path).
    N2, H2, W2 = 2, 10, 10
    y_pred2 = jax.random.normal(k3, (N2, C, H2, W2), dtype=jnp.float32)
    y_true2 = jax.random.randint(k4, (N2, H2, W2), 0, C, dtype=jnp.int32)
    alpha2 = jnp.array([0.5, 1.0, 1.5, 2.0], dtype=jnp.float32)
    out2 = jax.block_until_ready(focal_loss(y_pred2, y_true2, alpha=alpha2))
    ref2 = _reference_focal_loss(y_pred2, y_true2, alpha=alpha2)
    assert jnp.allclose(out2, ref2, rtol=1e-5, atol=1e-5), (out2, ref2)

    print("KERNEL_OK")
</pallas_src>

<mosaic_0001>
module attributes {stable_mosaic.version = 11 : i64} {
  func.func @_focal_kernel(%arg0: i32, %arg1: i32, %arg2: memref<4xf32, #tpu.memory_space<smem>>, %arg3: memref<1x4x2x128xf32, #tpu.memory_space<vmem>>, %arg4: memref<1x2x128xi32, #tpu.memory_space<vmem>>, %arg5: memref<1x1xf32, #tpu.memory_space<vmem>>, %arg6: memref<2x128xf32, #tpu.memory_space<vmem>>) attributes {dimension_semantics = [#tpu.dimension_semantics<arbitrary>, #tpu.dimension_semantics<arbitrary>], iteration_bounds = array<i64: 2, 1>, scalar_prefetch = 0 : i64, scratch_operands = 1 : i64, tpu.core_type = #tpu.core_type<tc>, window_params = [{transform_indices = @transform_0, window_bounds = array<i64: 4>}, {transform_indices = @transform_1, window_bounds = array<i64: 1, 4, 2, 128>}, {transform_indices = @transform_2, window_bounds = array<i64: 1, 2, 128>}, {pipeline_mode = #tpu.pipeline_mode<synchronous>, transform_indices = @transform_3, window_bounds = array<i64: 1, 1>}]} {
    %c0_i32 = arith.constant 0 : i32
    %0 = arith.cmpi eq, %arg0, %c0_i32 : i32
    %c0_i32_0 = arith.constant 0 : i32
    %1 = arith.cmpi eq, %arg1, %c0_i32_0 : i32
    %2 = arith.andi %0, %1 : i1
    %3 = arith.extui %2 : i1 to i32
    %c0_i32_1 = arith.constant 0 : i32
    %4 = arith.cmpi ne, %3, %c0_i32_1 : i32
    scf.if %4 {
      %cst_35 = arith.constant 0.000000e+00 : f32
      %80 = vector.broadcast %cst_35 : f32 to vector<2x128xf32>
      %c0_36 = arith.constant 0 : index
      %c0_37 = arith.constant 0 : index
      %81 = vector.load %arg6[%c0_36, %c0_37] : memref<2x128xf32, #tpu.memory_space<vmem>>, vector<2x128xf32>
      tpu.vector_store %arg6[%c0_36, %c0_37], %80 {strides = array<i32>} : memref<2x128xf32, #tpu.memory_space<vmem>>, vector<2x128xf32>,
    } else {
    }
    %c0 = arith.constant 0 : index
    %c0_2 = arith.constant 0 : index
    %c0_3 = arith.constant 0 : index
    %5 = vector.load %arg4[%c0, %c0_2, %c0_3] : memref<1x2x128xi32, #tpu.memory_space<vmem>>, vector<1x2x128xi32>
    %6 = vector.shape_cast %5 : vector<1x2x128xi32> to vector<2x128xi32>
    %c0_4 = arith.constant 0 : index
    %c0_5 = arith.constant 0 : index
    %c0_6 = arith.constant 0 : index
    %c0_7 = arith.constant 0 : index
    %7 = vector.load %arg3[%c0_4, %c0_5, %c0_6, %c0_7] : memref<1x4x2x128xf32, #tpu.memory_space<vmem>>, vector<1x1x2x128xf32>
    %8 = vector.shape_cast %7 : vector<1x1x2x128xf32> to vector<2x128xf32>
    %c0_8 = arith.constant 0 : index
    %c1 = arith.constant 1 : index
    %c0_9 = arith.constant 0 : index
    %c0_10 = arith.constant 0 : index
    %9 = vector.load %arg3[%c0_8, %c1, %c0_9, %c0_10] : memref<1x4x2x128xf32, #tpu.memory_space<vmem>>, vector<1x1x2x128xf32>
    %10 = vector.shape_cast %9 : vector<1x1x2x128xf32> to vector<2x128xf32>
    %c0_11 = arith.constant 0 : index
    %c2 = arith.constant 2 : index
    %c0_12 = arith.constant 0 : index
    %c0_13 = arith.constant 0 : index
    %11 = vector.load %arg3[%c0_11, %c2, %c0_12, %c0_13] : memref<1x4x2x128xf32, #tpu.memory_space<vmem>>, vector<1x1x2x128xf32>
    %12 = vector.shape_cast %11 : vector<1x1x2x128xf32> to vector<2x128xf32>
    %c0_14 = arith.constant 0 : index
    %c3 = arith.constant 3 : index
    %c0_15 = arith.constant 0 : index
    %c0_16 = arith.constant 0 : index
    %13 = vector.load %arg3[%c0_14, %c3, %c0_15, %c0_16] : memref<1x4x2x128xf32, #tpu.memory_space<vmem>>, vector<1x1x2x128xf32>
    %14 = vector.shape_cast %13 : vector<1x1x2x128xf32> to vector<2x128xf32>
    %15 = arith.maximumf %8, %10 : vector<2x128xf32>
    %16 = arith.maximumf %15, %12 : vector<2x128xf32>
    %17 = arith.maximumf %16, %14 : vector<2x128xf32>
    %cst = arith.constant 0.000000e+00 : f32
    %18 = vector.broadcast %cst : f32 to vector<2x128xf32>
    %cst_17 = arith.constant 0.000000e+00 : f32
    %19 = vector.broadcast %cst_17 : f32 to vector<2x128xf32>
    %cst_18 = arith.constant 0.000000e+00 : f32
    %20 = vector.broadcast %cst_18 : f32 to vector<2x128xf32>
    %21 = arith.subf %8, %17 : vector<2x128xf32>
    %22 = math.exp %21 : vector<2x128xf32>
    %23 = arith.addf %18, %22 : vector<2x128xf32>
    %c0_i32_19 = arith.constant 0 : i32
    %24 = vector.broadcast %c0_i32_19 : i32 to vector<2x128xi32>
    %25 = arith.cmpi eq, %6, %24 : vector<2x128xi32>
    %26 = arith.select %25, %8, %19 : vector<2x128xi1>, vector<2x128xf32>
    %c0_20 = arith.constant 0 : index
    %27 = memref.load %arg2[%c0_20] : memref<4xf32, #tpu.memory_space<smem>>
    %28 = vector.broadcast %27 : f32 to vector<2x128xf32>
    %29 = arith.select %25, %28, %20 : vector<2x128xi1>, vector<2x128xf32>
    %30 = arith.subf %10, %17 : vector<2x128xf32>
    %31 = math.exp %30 : vector<2x128xf32>
    %32 = arith.addf %23, %31 : vector<2x128xf32>
    %c1_i32 = arith.constant 1 : i32
    %33 = vector.broadcast %c1_i32 : i32 to vector<2x128xi32>
    %34 = arith.cmpi eq, %6, %33 : vector<2x128xi32>
    %35 = arith.select %34, %10, %26 : vector<2x128xi1>, vector<2x128xf32>
    %c1_21 = arith.constant 1 : index
    %36 = memref.load %arg2[%c1_21] : memref<4xf32, #tpu.memory_space<smem>>
    %37 = vector.broadcast %36 : f32 to vector<2x128xf32>
    %38 = arith.select %34, %37, %29 : vector<2x128xi1>, vector<2x128xf32>
    %39 = arith.subf %12, %17 : vector<2x128xf32>
    %40 = math.exp %39 : vector<2x128xf32>
    %41 = arith.addf %32, %40 : vector<2x128xf32>
    %c2_i32 = arith.constant 2 : i32
    %42 = vector.broadcast %c2_i32 : i32 to vector<2x128xi32>
    %43 = arith.cmpi eq, %6, %42 : vector<2x128xi32>
    %44 = arith.select %43, %12, %35 : vector<2x128xi1>, vector<2x128xf32>
    %c2_22 = arith.constant 2 : index
    %45 = memref.load %arg2[%c2_22] : memref<4xf32, #tpu.memory_space<smem>>
    %46 = vector.broadcast %45 : f32 to vector<2x128xf32>
    %47 = arith.select %43, %46, %38 : vector<2x128xi1>, vector<2x128xf32>
    %48 = arith.subf %14, %17 : vector<2x128xf32>
    %49 = math.exp %48 : vector<2x128xf32>
    %50 = arith.addf %41, %49 : vector<2x128xf32>
    %c3_i32 = arith.constant 3 : i32
    %51 = vector.broadcast %c3_i32 : i32 to vector<2x128xi32>
    %52 = arith.cmpi eq, %6, %51 : vector<2x128xi32>
    %53 = arith.select %52, %14, %44 : vector<2x128xi1>, vector<2x128xf32>
    %c3_23 = arith.constant 3 : index
    %54 = memref.load %arg2[%c3_23] : memref<4xf32, #tpu.memory_space<smem>>
    %55 = vector.broadcast %54 : f32 to vector<2x128xf32>
    %56 = arith.select %52, %55, %47 : vector<2x128xi1>, vector<2x128xf32>
    %57 = arith.subf %53, %17 : vector<2x128xf32>
    %58 = math.log %50 : vector<2x128xf32>
    %59 = arith.subf %57, %58 : vector<2x128xf32>
    %cst_24 = arith.constant -9.21034049 : f32
    %cst_25 = arith.constant 0.000000e+00 : f32
    %60 = vector.broadcast %cst_24 : f32 to vector<2x128xf32>
    %61 = arith.maximumf %60, %59 : vector<2x128xf32>
    %62 = vector.broadcast %cst_25 : f32 to vector<2x128xf32>
    %63 = arith.minimumf %62, %61 : vector<2x128xf32>
    %64 = math.exp %63 : vector<2x128xf32>
    %cst_26 = arith.constant 0.000000e+00 : f32
    %65 = vector.broadcast %cst_26 : f32 to vector<2x128xf32>
    %66 = arith.subf %65, %56 : vector<2x128xf32>
    %cst_27 = arith.constant 1.000000e+00 : f32
    %67 = vector.broadcast %cst_27 : f32 to vector<2x128xf32>
    %68 = arith.subf %67, %64 : vector<2x128xf32>
    %69 = arith.mulf %68, %68 : vector<2x128xf32>
    %70 = arith.mulf %66, %69 : vector<2x128xf32>
    %71 = arith.mulf %70, %63 : vector<2x128xf32>
    %c0_28 = arith.constant 0 : index
    %c0_29 = arith.constant 0 : index
    %72 = vector.load %arg6[%c0_28, %c0_29] : memref<2x128xf32, #tpu.memory_space<vmem>>, vector<2x128xf32>
    %73 = arith.addf %72, %71 : vector<2x128xf32>
    %c0_30 = arith.constant 0 : index
    %c0_31 = arith.constant 0 : index
    %74 = vector.load %arg6[%c0_30, %c0_31] : memref<2x128xf32, #tpu.memory_space<vmem>>, vector<2x128xf32>
    tpu.vector_store %arg6[%c0_30, %c0_31], %73 {strides = array<i32>} : memref<2x128xf32, #tpu.memory_space<vmem>>, vector<2x128xf32>,
    %c1_i32_32 = arith.constant 1 : i32
    %75 = arith.cmpi eq, %arg0, %c1_i32_32 : i32
    %c0_i32_33 = arith.constant 0 : i32
    %76 = arith.cmpi eq, %arg1, %c0_i32_33 : i32
    %77 = arith.andi %75, %76 : i1
    %78 = arith.extui %77 : i1 to i32
    %c0_i32_34 = arith.constant 0 : i32
    %79 = arith.cmpi ne, %78, %c0_i32_34 : i32
    scf.if %79 {
      %c0_35 = arith.constant 0 : index
      %c0_36 = arith.constant 0 : index
      %80 = vector.load %arg6[%c0_35, %c0_36] : memref<2x128xf32, #tpu.memory_space<vmem>>, vector<2x128xf32>
      %81 = vector.shape_cast %80 : vector<2x128xf32> to vector<1x2x128xf32>
      %cst_37 = arith.constant dense<0.000000e+00> : vector<1xf32>
      %82 = vector.multi_reduction <add>, %81, %cst_37 [1, 2] : vector<1x2x128xf32> to vector<1xf32>
      %83 = vector.shape_cast %82 : vector<1xf32> to vector<1x1x1xf32>
      %84 = vector.extract %83[0, 0, 0] : f32 from vector<1x1x1xf32>
      %cst_38 = arith.constant 0.001953125 : f32
      %85 = arith.mulf %84, %cst_38 : f32
      %86 = vector.broadcast %85 : f32 to vector<1x1xf32>
      %c0_39 = arith.constant 0 : index
      %c0_40 = arith.constant 0 : index
      %87 = vector.load %arg5[%c0_39, %c0_40] : memref<1x1xf32, #tpu.memory_space<vmem>>, vector<1x1xf32>
      tpu.vector_store %arg5[%c0_39, %c0_40], %86 {strides = array<i32>} : memref<1x1xf32, #tpu.memory_space<vmem>>, vector<1x1xf32>,
    } else {
    }
    return
  }
  func.func @transform_0(%arg0: i32, %arg1: i32) -> i32 {
    %c0_i32 = arith.constant 0 : i32
    %c0_i32_0 = arith.constant 0 : i32
    return %c0_i32 : i32
  }
  func.func @transform_1(%arg0: i32, %arg1: i32) -> (i32, i32, i32, i32) {
    %c0_i32 = arith.constant 0 : i32
    %c0_i32_0 = arith.constant 0 : i32
    %c0_i32_1 = arith.constant 0 : i32
    return %arg0, %c0_i32, %arg1, %c0_i32_0 : i32, i32, i32, i32
  }
  func.func @transform_2(%arg0: i32, %arg1: i32) -> (i32, i32, i32) {
    %c0_i32 = arith.constant 0 : i32
    %c0_i32_0 = arith.constant 0 : i32
    return %arg0, %arg1, %c0_i32 : i32, i32, i32
  }
  func.func @transform_3(%arg0: i32, %arg1: i32) -> (i32, i32) {
    %c0_i32 = arith.constant 0 : i32
    %c0_i32_0 = arith.constant 0 : i32
    %c0_i32_1 = arith.constant 0 : i32
    return %c0_i32, %c0_i32_0 : i32, i32
  }
}

</mosaic_0001>

<bundles_post_ra>
// kernel: tpu_custom_call.1
= control target key start
LH: loop header
LB: loop body
LE: loop exit
PB: predicated region body
PF: predicated region fallthrough
CT: control target
= control target key end

     0   :  { %8 = vsyncpa [#allocation6], 0  ;;  %s883_s0 = inlined_call_operand.hbm [shape: f32[4], index: 0, kind: input, shape index: {}]   ;;  %s884_s1 = inlined_call_operand.hbm [shape: f32[2,4,2,128], index: 1, kind: input, shape index: {}]   ;;  %s885_s2 = inlined_call_operand.vmem [shape: s32[2,2,128], index: 2, kind: input, shape index: {}]   ;;  %s886_s3 = inlined_call_operand.hbm [shape: f32[1,1], index: 3, kind: output, shape index: {}]  }
   0x1   :  { %9 = vsyncpa [#allocation4], 0 }
   0x2   :  { %11 = vsyncpa [#allocation4 + $0x1], 0 }
   0x3   :  { %12 = vsyncpa [#allocation5], 0  ;;  %s689_s12 = smov 0   ;;  %s691_s13 = smov 0  }
   0x4   :  { %s693_s14 = smov 0   ;;  %s695_s15 = smov 0  }
   0x5   :  { %s697_s16 = smov 0   ;;  %s699_s17 = smov 0  }
   0x6 LB: > { %s418_s18 = sadd.s32 4294967295, %s661_s17   ;;  %s60_s19 = sadd.s32 1, %s649_s14  ;;  %s661_s17 = sphi %s699_s17, %s18_s17   ;;  %s657_s16 = sphi %s697_s16, %s901_s16   ;;  %s653_s15 = sphi %s695_s15, %s900_s15   ;;  %s649_s14 = sphi %s693_s14, %s899_s14   ;;  %s645_s13 = sphi %s691_s13, %s898_s13   ;;  %s641_s12 = sphi %s689_s12, %s897_s12  }
   0x7   : > { %p67_p0 = scmp.ne.s32.totalorder %s649_s14, %s645_s13  ;;  %p68_p1 = scmp.eq.s32.totalorder %s661_s17, 0 }
   0x8   : > { %p73_p2 = scmp.ne.s32.totalorder %s645_s13, %s641_s12  ;;  %p725_p3 = scmp.eq.s32.totalorder %s418_s18, 0 }
   0x9   : > { %p69_p4 = por %p68_p1, %p67_p0  ;;  %p419_p5 = scmp.ge.s32.totalorder %s661_s17, 1 }
   0xa   : > { %s890_s20 = scalar_select %p725_p3, 1, 0 }
   0xb   : > { %p732_p6 = por %p725_p3, %p73_p2  ;;  %p133_p7 = scmp.lt.s32.totalorder %s661_s17, 3 }
   0xc   : > { %p465_p9 = scmp.lt.s32.totalorder %s661_s17, 2  ;;  %s30_s24 = sadd.s32 1, %s657_s16 }
   0xd   : > { %s891_s21 = scalar_select %p732_p6, 1, 0 }
   0xe   : > { %p737_p8 = pnand %p419_p5, %p133_p7  ;;  %p744_p11 = pnand %p465_p9, %p69_p4 }
   0xf   : > { %p32_p13 = scmp.ge.s32.totalorder %s30_s24, 2  ;;  %s155_s25 = sand.u32 1, %s649_s14  }
  0x10   : > { %p456_p10 = pneg %p737_p8  ;;  %s534_s28 = scalar_lea.hbm %s883_s0, 16 }
  0x11   : > { %p535_p0 = scmp.ne.s32.totalorder %s883_s0, %s534_s28  ;;  %p541_p4 = scmp.lt.u32.totalorder %s534_s28, %s883_s0 }
  0x12   : > { %p457_p12 = pnand %p456_p10, %p725_p3 }
  0x14   : > { %p536_p1 = pneg %p457_p12 }
  0x16   : > { %p537_p2 = pnand %p536_p1, %p535_p0 }
  0x18   : > { %p538_p5 = pneg %p537_p2 }
  0x1a   : > { %p543_p7 = pnand %p541_p4, %p538_p5 }
  0x1c   : > { %546 = shalt.err (!%p543_p7)
}
  0x1d   : > { %s663_s6 = smov [#allocation3]   ;;  %s903_s24 = smov (%p32_p13, %s30_s24), 0 }
  0x1e   : > { %459 = dma.hbm_to_smem (!%p457_p12), %s883_s0, 16, %s663_s6, [#allocation6]  }
  0x1f   : > { %s422_s9 = sshll.u32 %s155_s25, 3  ;;  %s441_s10 = sshll.u32 %s657_s16, 7 }
  0x20   : > { %s55_s11 = ssub.s32 %s657_s16, %s903_s24  ;;  %s772_s27 = scalar_lea.hbm %s884_s1, %s441_s10 }
  0x21   : > { %p58_p9 = scmp.eq.s32.totalorder %s55_s11, 0  ;;  %s159_s28 = scalar_lea.vmem [#allocation7], %s422_s9 }
  0x22   : > { %s167_s29 = sshll.u32 %s159_s28, 4  ;;  %s781_s4 = scalar_lea.sflag [#allocation4], %s155_s25  ;;  %s779_s29 = int_to_ptr.vmem [resolvable:$true] %s167_s29 }
  0x23   : > { %s777_s30 = scalar_select %p58_p9, %s649_s14, %s60_s19  }
  0x24   : > { %s547_s5 = scalar_lea.hbm %s772_s27, 128  ;;  %p549_p12 = pneg %p744_p11 }
  0x25   : > { %p548_p10 = scmp.ne.s32.totalorder %s772_s27, %s547_s5  ;;  %s552_s8 = scalar_lea.hbm %s884_s1, 256 }
  0x26   : > { %p553_p1 = scmp.lt.u32.totalorder %s772_s27, %s884_s1  ;;  %p554_p2 = scmp.lt.u32.totalorder %s552_s8, %s547_s5 }
  0x27   : > { %p550_p13 = pnand %p549_p12, %p548_p10  ;;  %p556_p4 = scmp.lt.u32.totalorder %s547_s5, %s772_s27 }
  0x28   : > { %p555_p5 = por %p554_p2, %p553_p1 }
  0x29   : > { %p551_p0 = pneg %p550_p13 }
  0x2a   : > { %p557_p7 = por %p556_p4, %p555_p5 }
  0x2c   : > { %p558_p9 = pnand %p557_p7, %p551_p0 }
  0x2e   : > { %561 = shalt.err (!%p558_p9)
}
  0x2f   : > { %s562_s19 = scalar_lea.vmem %s779_s29, 128  ;;  %s664_s25 = smov [#allocation7]  }
  0x30   : > { %p563_p10 = scmp.ne.s32.totalorder %s779_s29, %s562_s19  ;;  %s567_s11 = sshll.u32 %s664_s25, 4  ;;  %s568_s11 = int_to_ptr.vmem [resolvable:$false] %s567_s11 }
  0x31   : > { %s569_s12 = scalar_lea.vmem %s568_s11, 256  ;;  %p570_p3 = scmp.lt.s32.totalorder %s779_s29, %s568_s11 }
  0x32   : > { %p565_p13 = pnand %p563_p10, %p549_p12  ;;  %p571_p1 = scmp.lt.s32.totalorder %s569_s12, %s562_s19 }
  0x34   : > { %p566_p6 = pneg %p565_p13  ;;  %p572_p2 = por %p571_p1, %p570_p3 }
  0x36   : > { %p573_p5 = pnand %p572_p2, %p566_p6 }
  0x38   : > { %576 = shalt.err (!%p573_p5)
}
  0x39   : > { %s665_s26 = smov 32   ;;  %s666_s28 = smov 2  }
  0x3a   : > { %463 = dma.hbm_to_vmem [thread:$0]  (!%p744_p11), %s772_s27, 128, %s779_s29, %s781_s4, %s665_s26, %s665_s26, %s666_s28  }
  0x3b   : > { %189 = sbr.rel (%p737_p8) target bundleno = 396 (0x18c), region = 32  ;;  %p894_p12 = scmp.ne.s32.totalorder (!%p737_p8), %s890_s20, 0 }
  0x42   : > { %628 = dma.done.wait (%p894_p12), [#allocation6], 16  }
  0x43   : > { %630 = vsyncadd (%p894_p12), [#allocation6], 4294967280  ;;  %s195_s5 = sand.u32 1, %s645_s13   ;;  %p895_p3 = scmp.ne.s32.totalorder %s891_s21, 0 }
  0x44   : > { %s427_s6 = sshll.u32 %s195_s5, 3  ;;  %s196_s7 = scalar_lea.sflag [#allocation4], %s195_s5 }
  0x45   : > { %s199_s8 = scalar_lea.vmem [#allocation7], %s427_s6 }
  0x46   : > { %632 = dma.done.wait (%p895_p3), %s196_s7, 128  }
  0x47   : > { %634 = vsyncadd (%p895_p3), %s196_s7, 4294967168 }
  0x48   : > { %204 = sfence }
  0x49   : > { %p225_p6 = scmp.lt.s32.totalorder %s653_s15, 1  ;;  %p232_p8 = scmp.eq.s32.totalorder %s653_s15, 0 }
  0x4a   : > { %v667_v0 = vmov (%p232_p8), 0.0  }
  0x4b   : > { %s226_s22 = scalar_select %p225_p6, %s653_s15, 1 }
  0x4c   : > { %237 = sbr.rel (!%p232_p8) target bundleno = 83 (0x53), region = 44  ;;  %238 = vst [vmem:[#allocation2] sm:$0x3] (%p232_p8), %v667_v0 }
  0x4d   : > { %s428_s20 = sshll.u32 %s226_s22, 1 }
  0x4e   : > { %s231_s29 = scalar_lea.vmem %s885_s2, %s428_s20 }
  0x53 PF: > { %v240_v1 = vld [vmem:[%s199_s8] sm:$0x3]  ;;  %v430_v2 = vld [vmem:[%s199_s8 + $0x2] sm:$0x3]  ;;  %v431_v3 = vld [vmem:[%s199_s8 + $0x4] sm:$0x3] }
  0x54   : > { %v247_v4 = vmax.f32 %v240_v1, %v430_v2  ;;  %v432_v5 = vld [vmem:[%s199_s8 + $0x6] sm:$0x3]  ;;  %p302_p11 = scmp.eq.s32.totalorder %s653_s15, 1  ;;  %v239_v16 = vld [vmem:[%s231_s29] sm:$0x3]  ;;  %s256_s21 = sld [smem:[#allocation3]] }
  0x55   : > { %vm254_vm0 = vcmp.eq.s32.totalorder %v239_v16, 0  ;;  %vm263_vm1 = vcmp.eq.s32.totalorder %v239_v16, 1  ;;  %vm272_vm2 = vcmp.eq.s32.totalorder %v239_v16, 2  ;;  %vm281_vm3 = vcmp.eq.s32.totalorder %v239_v16, 3  ;;  %s433_s4 = sld [smem:[#allocation3 + $0x1]]  ;;  %s434_s9 = sld [smem:[#allocation3 + $0x2]] }
  0x56   : > { %v248_v6 = vmax.f32 %v247_v4, %v431_v3  ;;  %v255_v23 = vsel %vm254_vm0, %v240_v1, 0.0  ;;  %s435_s10 = sld [smem:[#allocation3 + $0x3]]  ;;  %v299_v48 = vld [vmem:[#allocation2] sm:$0x3]  ;;  %vm308_vm4 = vcmask (%p302_p11), 1041408   ;;  %vm321_vm5 = vcmask (%p302_p11), 0  }
  0x57   : > { %v264_v25 = vsel %vm263_vm1, %v430_v2, %v255_v23 }
  0x58   : > { %v249_v7 = vmax.f32 %v248_v6, %v432_v5  ;;  %v273_v26 = vsel %vm272_vm2, %v431_v3, %v264_v25 }
  0x59   : > { %v282_v27 = vsel %vm281_vm3, %v432_v5, %v273_v26 }
  0x5a   : > { %v250_v8 = vsub.f32 %v240_v1, %v249_v7  ;;  %v259_v9 = vsub.f32 %v430_v2, %v249_v7  ;;  %v268_v10 = vsub.f32 %v431_v3, %v249_v7  ;;  %v277_v11 = vsub.f32 %v432_v5, %v249_v7 }
  0x5b   : > { %v286_v28 = vsub.f32 %v282_v27, %v249_v7  ;;  %v257_v33 = vstv %s256_s21  ;;  %v266_v37 = vstv %s433_s4  ;;  %v275_v39 = vstv %s434_s9 }
  0x5c   : > { %v251_v12 = vmul.f32 1.442695, %v250_v8  ;;  %v260_v13 = vmul.f32 1.442695, %v259_v9  ;;  %v269_v14 = vmul.f32 1.442695, %v268_v10  ;;  %v284_v41 = vstv %s435_s10 }
  0x5d   : > { %v278_v15 = vmul.f32 1.442695, %v277_v11  ;;  %v258_v36 = vsel %vm254_vm0, %v257_v33, 0.0 }
  0x5e   : > { %522 = vpow2.f32 %v251_v12  ;;  %v267_v38 = vsel %vm263_vm1, %v266_v37, %v258_v36 }
  0x5f   : > { %524 = vpow2.f32 %v260_v13  ;;  %v276_v40 = vsel %vm272_vm2, %v275_v39, %v267_v38 }
  0x60   : > { %526 = vpow2.f32 %v269_v14  ;;  %v285_v42 = vsel %vm281_vm3, %v284_v41, %v276_v40 }
  0x61   : > { %528 = vpow2.f32 %v278_v15  ;;  %v294_v44 = vsub.f32 0.0, %v285_v42 }
  0x68   : > { %v523_v17 = vpop.eup %522 }
  0x69   : > { %v525_v18 = vpop.eup %524 }
  0x6a   : > { %v527_v19 = vpop.eup %526  ;;  %v262_v20 = vadd.f32 %v525_v18, %v523_v17 }
  0x6b   : > { %v529_v21 = vpop.eup %528 }
  0x6c   : > { %v271_v22 = vadd.f32 %v527_v19, %v262_v20 }
  0x6e   : > { %v280_v24 = vadd.f32 %v529_v21, %v271_v22 }
  0x70   : > { %530 = vlog2.f32 %v280_v24 }
  0x7a   : > { %v531_v29 = vpop.eup %530 }
  0x7b   : > { %v288_v30 = vmul.f32 0.6931472, %v531_v29 }
  0x7d   : > { %v289_v31 = vsub.f32 %v286_v28, %v288_v30 }
  0x7f   : > { %v290_v32 = vmax.f32 %v289_v31, -9.2103405 }
  0x81   : > { %v291_v34 = vmin.f32 %v290_v32, 0.0 }
  0x83   : > { %v292_v35 = vmul.f32 1.442695, %v291_v34 }
  0x85   : > { %532 = vpow2.f32 %v292_v35 }
  0x8f   : > { %v533_v43 = vpop.eup %532 }
  0x90   : > { %v295_v45 = vsub.f32 1.0, %v533_v43 }
  0x92   : > { %v296_v46 = vmul.f32 %v295_v45, %v295_v45 }
  0x94   : > { %v297_v47 = vmul.f32 %v296_v46, %v294_v44  ;;  %306 = sbr.rel (!%p302_p11) target bundleno = 371 (0x173), region = 48 }
  0x96   : > { %v298_v49 = vmul.f32 %v297_v47, %v291_v34 }
  0x98   : > { %v300_v50 = vadd.f32 %v299_v48, %v298_v49 }
  0x9a   : > { %301 = vst [vmem:[#allocation2] sm:$0x3] %v300_v50 }
  0xa1   : > { %v307_v51 = vld [vmem:[#allocation2] sm:$0x3] }
  0xa2   : > { %v309_v52 = vsel %vm308_vm4, %v307_v51, 0.0 }
  0xa3   : > { %310 = vadd.xlane.f32.xlu0 %v309_v52 }
 0x130   : > { %v311_v53 = vpop.xlane.xlu0 %310 }
 0x131   : > { %v312_v54 = vrot.slane %v311_v53, 4 }
 0x133   : > { %v313_v55 = vadd.f32 %v312_v54, %v311_v53 }
 0x135   : > { %v314_v56 = vrot.slane %v313_v55, 2 }
 0x137   : > { %v315_v57 = vadd.f32 %v314_v56, %v313_v55 }
 0x139   : > { %v316_v58 = vrot.slane %v315_v57, 1 }
 0x13b   : > { %v317_v59 = vadd.f32 %v316_v58, %v315_v57 }
 0x13d   : > { %444 = vpush %v317_v59 }
 0x16e   : > { %s445_s19 = spop %444 }
 0x16f   : > { %s319_s25 = smul.f32 0.001953125, %s445_s19 }
 0x171   : > { %v320_v60 = vstv %s319_s25 }
 0x172   : > { %322 = vst.msk [vmem:[#allocation8] sm:$0x1] %vm321_vm5, %v320_v60 }
 0x173 PF: > { %p839_p0 = scmp.eq.s32.totalorder %s418_s18, 1  ;;  %s668_s11 = smov [#allocation8]  }
 0x174   : > { %s330_s12 = sshll.u32 %s668_s11, 4  ;;  %s331_s12 = int_to_ptr.vmem [resolvable:$true] %s330_s12 }
 0x175   : > { %s577_s26 = scalar_lea.vmem %s331_s12, 16  ;;  %s583_s28 = scalar_lea.vmem %s331_s12, 32 }
 0x176   : > { %p578_p4 = scmp.ne.s32.totalorder %s331_s12, %s577_s26  ;;  %p584_p10 = scmp.lt.s32.totalorder %s331_s12, %s331_s12 }
 0x177   : > { %p585_p13 = scmp.lt.s32.totalorder %s583_s28, %s577_s26 }
 0x178   : > { %p579_p7 = pnand %p578_p4, %p839_p0 }
 0x179   : > { %p586_p1 = por %p585_p13, %p584_p10 }
 0x17a   : > { %p580_p9 = pneg %p579_p7 }
 0x17c   : > { %p587_p2 = pnand %p586_p1, %p580_p9 }
 0x17e   : > { %590 = shalt.err (!%p587_p2)
}
 0x17f   : > { %s591_s6 = scalar_lea.hbm %s886_s3, 16 }
 0x180   : > { %p592_p5 = scmp.ne.s32.totalorder %s886_s3, %s591_s6  ;;  %p597_p6 = scmp.lt.u32.totalorder %s591_s6, %s886_s3 }
 0x182   : > { %p593_p12 = pnand %p592_p5, %p839_p0 }
 0x184   : > { %p594_p3 = pneg %p593_p12 }
 0x186   : > { %p599_p8 = pnand %p597_p6, %p594_p3 }
 0x188   : > { %602 = shalt.err (!%p599_p8)
}
 0x189   : > { %453 = dma.vmem_to_hbm [thread:$0]  (%p839_p0), %s331_s12, 16, %s886_s3, [#allocation5]  }
 0x18a   : > { %636 = dma.done.wait (%p839_p0), [#allocation5], 16  }
 0x18b   : > { %638 = vsyncadd (%p839_p0), [#allocation5], 4294967280 }
 0x18c PF: > { %s18_s17 = sadd.s32 1, %s661_s17   ;;  %s897_s12 = smov %s645_s13 }
 0x18d   : > { %p15_p11 = scmp.ge.s32.totalorder %s18_s17, 4   ;;  %s898_s13 = smov %s649_s14 }
 0x18e   : > { %s899_s14 = smov %s777_s30  ;;  %s900_s15 = smov %s657_s16 }
 0x18f   : > { %s901_s16 = smov %s903_s24  ;;  %17 = sbr.rel (!%p15_p11) target bundleno = 6 (0x6), region = 88 }
 0x196   :  { %343 = vsyncpa [#allocation4], 1 }
 0x197   :  { %345 = vsyncpa [#allocation4 + $0x1], 1 }
 0x198   :  { %346 = vsyncpa [#allocation5], 1 }
 0x199   :  { %348 = vsyncpa [#allocation5 + $0x1], 1 }
 0x19a   :  { %349 = vsyncpa [#allocation6], 1 }
 0x19b   :  { %351 = vsyncpa [#allocation6 + $0x1], 1 }

</bundles_post_ra>
